<compile_context>
chip_gen: v6e
topology: v6e:2x2x1
jax: 0.10.0
libtpu: 0.0.40
codegen_flags: <defaults>
</compile_context>

<pallas_src>
import jax
import jax.numpy as jnp
from jax.experimental import pallas as pl
from jax.experimental.pallas import tpu as pltpu  # noqa: F401  (TPU backend)

N, T = 2, 16                  # batch, series length
CIN, C1, C2 = 1, 16, 32       # channel widths
K, PAD = 5, 2                 # conv kernel size / padding
T2, T4 = T // 2, T // 4       # lengths after each maxpool
LATENT = 32                   # latent_dim
NCLASS = 2                    # output classes


# ----------------------------------------------------------------- kernel ---

def ecg_fused_kernel(xp_ref, w1_ref, b1_ref, w2_ref, b2_ref,
                     wf1_ref, bf1_ref, wf2_ref, bf2_ref, o_ref):
    """Whole network, whole batch, one invocation, no scratch."""
    b1 = b1_ref[...]                                   # (1, C1)
    zeros_c1 = jnp.zeros((8, C1), jnp.float32)
    zeros_c2 = jnp.zeros((8, C2), jnp.float32)

    cols = []
    for n in range(N):                                 # static unroll (N == 2)
        # conv1 (Cin == 1): 5 broadcast FMAs on the VPU, (T,1) * (1,C1)
        acc = xp_ref[n, 0:T, :] * w1_ref[0]
        for k in range(1, K):
            acc = acc + xp_ref[n, k:k + T, :] * w1_ref[k]
        h1 = jnp.maximum(acc + b1, 0.0)                # (T, C1)

        # maxpool1, kept dilated and pre-padded for conv2:
        #   h1p rows 8..23 hold h1, zeros elsewhere (tile-aligned concat)
        #   d1p[j] = max(h1[j-4], h1[j-3])  ->  d1p[2t+4] = pool1[t]
        h1p = jnp.concatenate([zeros_c1, h1, zeros_c1], axis=0)    # (32, C1)
        d1p = jnp.maximum(h1p[4:28, :], h1p[5:29, :])              # (24, C1)

        # conv2 im2col in dilated space: tap k reads rows shifted by 2k.
        # Even output rows r=2t see pool1[t+k-2] (zero outside), odd rows junk.
        col = jnp.concatenate([d1p[2 * k:2 * k + T, :] for k in range(K)],
                              axis=1)                  # (T, K*C1) = (16, 80)
        cols.append(col)

    col_all = jnp.concatenate(cols, axis=0)            # (N*T, K*C1) = (32, 80)

    # conv2 for the whole batch as ONE MXU matmul
    o2 = jnp.dot(col_all, w2_ref[...], preferred_element_type=jnp.float32)
    o2 = jnp.maximum(o2 + b2_ref[...], 0.0)            # (32, C2); valid at even rows

    # maxpool2, dilated-by-4: p2[n*T + 4t] = max(relu2[2t], relu2[2t+1])
    o2x = jnp.concatenate([o2, zeros_c2], axis=0)      # (40, C2)
    p2 = jnp.maximum(o2x[0:N * T, :], o2x[2:N * T + 2, :])         # (32, C2)

    # flatten: lane-concat the T4 valid rows per sample -> lane-dense (N, 128)
    # (torch's (C, L) flatten order is folded into wf1 host-side)
    feat = jnp.concatenate(
        [jnp.concatenate([p2[n * T + 4 * t: n * T + 4 * t + 1, :]
                          for t in range(T4)], axis=1)
         for n in range(N)], axis=0)                   # (N, T4*C2) = (2, 128)

    # head: fc1 -> ReLU -> fc2 (logits)
    h = jnp.dot(feat, wf1_ref[...], preferred_element_type=jnp.float32)
    h = jnp.maximum(h + bf1_ref[...], 0.0)             # (N, LATENT)
    o_ref[...] = (jnp.dot(h, wf2_ref[...], preferred_element_type=jnp.float32)
                  + bf2_ref[...])                      # (N, NCLASS)


# ---------------------------------------------------------------- wrapper ---

def classifier_ecg_forward(x, params):
    """x: (N, 1, T) float32, NCW like torch Conv1d."""
    w1, b1, w2, b2, wf1, bf1, wf2, bf2 = params

    # input glue: zero-pad time and put it on sublanes (single input channel)
    xp = jnp.pad(x[:, 0, :], ((0, 0), (PAD, PAD)))[:, :, None]      # (N, T+4, 1)

    # weight glue (host-side, free): tap-major conv1 weight, im2col'd conv2
    # weight, fc1 weight with the channel-major flatten folded in.
    w1k = jnp.transpose(w1, (2, 1, 0))                              # (K, 1, C1)
    w2m = jnp.transpose(w2, (2, 1, 0)).reshape(K * C1, C2)          # (80, 32)
    wf1m = jnp.transpose(wf1.reshape(LATENT, C2, T4),
                         (2, 1, 0)).reshape(T4 * C2, LATENT)        # (128, 32)
    wf2m = wf2.T                                                    # (32, 2)

    return pl.pallas_call(
        ecg_fused_kernel,
        out_shape=jax.ShapeDtypeStruct((N, NCLASS), jnp.float32),
    )(xp, w1k, b1[None, :], w2m, b2[None, :],
      wf1m, bf1[None, :], wf2m, bf2[None, :])


# -------------------------------------------------------------- reference ---

def reference_forward(x, params):
    w1, b1, w2, b2, wf1, bf1, wf2, bf2 = params

    def conv1d(h, w, b):
        y = jax.lax.conv_general_dilated(
            h, w, (1,), [(PAD, PAD)], dimension_numbers=("NCH", "OIH", "NCH"))
        return y + b[None, :, None]

    h = jax.nn.relu(conv1d(x, w1, b1))
    h = h.reshape(N, C1, T2, 2).max(-1)
    h = jax.nn.relu(conv1d(h, w2, b2))
    h = h.reshape(N, C2, T4, 2).max(-1)
    h = h.reshape(N, -1)
    h = jax.nn.relu(h @ wf1.T + bf1)
    return h @ wf2.T + bf2


# ------------------------------------------------------------------- main ---

if __name__ == "__main__":
    key = jax.random.PRNGKey(0)
    ks = jax.random.split(key, 9)
    w1 = jax.random.normal(ks[0], (C1, CIN, K), jnp.float32) * 0.3
    b1 = jax.random.normal(ks[1], (C1,), jnp.float32) * 0.1
    w2 = jax.random.normal(ks[2], (C2, C1, K), jnp.float32) * 0.1
    b2 = jax.random.normal(ks[3], (C2,), jnp.float32) * 0.1
    wf1 = jax.random.normal(ks[4], (LATENT, C2 * T4), jnp.float32) * 0.05
    bf1 = jax.random.normal(ks[5], (LATENT,), jnp.float32) * 0.1
    wf2 = jax.random.normal(ks[6], (NCLASS, LATENT), jnp.float32) * 0.1
    bf2 = jax.random.normal(ks[7], (NCLASS,), jnp.float32) * 0.1
    params = (w1, b1, w2, b2, wf1, bf1, wf2, bf2)

    x = jax.random.normal(ks[8], (N, CIN, T), jnp.float32)

    out = jax.block_until_ready(classifier_ecg_forward(x, params))
    ref = jax.block_until_ready(reference_forward(x, params))
    assert out.shape == (N, NCLASS)
    assert jnp.allclose(out, ref, atol=1e-3, rtol=1e-3), (out, ref)
    print("KERNEL_OK")
</pallas_src>

<mosaic_0001>
module attributes {stable_mosaic.version = 11 : i64} {
  func.func @ecg_fused_kernel(%arg0: memref<2x20x1xf32, #tpu.memory_space<vmem>>, %arg1: memref<5x1x16xf32, #tpu.memory_space<vmem>>, %arg2: memref<1x16xf32, #tpu.memory_space<vmem>>, %arg3: memref<80x32xf32, #tpu.memory_space<vmem>>, %arg4: memref<1x32xf32, #tpu.memory_space<vmem>>, %arg5: memref<128x32xf32, #tpu.memory_space<vmem>>, %arg6: memref<1x32xf32, #tpu.memory_space<vmem>>, %arg7: memref<32x2xf32, #tpu.memory_space<vmem>>, %arg8: memref<1x2xf32, #tpu.memory_space<vmem>>, %arg9: memref<2x2xf32, #tpu.memory_space<vmem>>) attributes {dimension_semantics = [], scalar_prefetch = 0 : i64, scratch_operands = 0 : i64, tpu.core_type = #tpu.core_type<tc>} {
    %c0 = arith.constant 0 : index
    %c0_0 = arith.constant 0 : index
    %0 = vector.load %arg2[%c0, %c0_0] : memref<1x16xf32, #tpu.memory_space<vmem>>, vector<1x16xf32>
    %cst = arith.constant 0.000000e+00 : f32
    %1 = vector.broadcast %cst : f32 to vector<8x16xf32>
    %cst_1 = arith.constant 0.000000e+00 : f32
    %2 = vector.broadcast %cst_1 : f32 to vector<8x32xf32>
    %c0_2 = arith.constant 0 : index
    %c0_3 = arith.constant 0 : index
    %c0_4 = arith.constant 0 : index
    %3 = vector.load %arg0[%c0_2, %c0_3, %c0_4] : memref<2x20x1xf32, #tpu.memory_space<vmem>>, vector<1x16x1xf32>
    %4 = vector.shape_cast %3 : vector<1x16x1xf32> to vector<16x1xf32>
    %c0_5 = arith.constant 0 : index
    %c0_6 = arith.constant 0 : index
    %c0_7 = arith.constant 0 : index
    %5 = vector.load %arg1[%c0_5, %c0_6, %c0_7] : memref<5x1x16xf32, #tpu.memory_space<vmem>>, vector<1x1x16xf32>
    %6 = vector.shape_cast %5 : vector<1x1x16xf32> to vector<1x16xf32>
    %7 = vector.broadcast %4 : vector<16x1xf32> to vector<16x16xf32>
    %8 = vector.broadcast %6 : vector<1x16xf32> to vector<16x16xf32>
    %9 = arith.mulf %7, %8 : vector<16x16xf32>
    %c0_8 = arith.constant 0 : index
    %c1 = arith.constant 1 : index
    %c0_9 = arith.constant 0 : index
    %10 = vector.load %arg0[%c0_8, %c1, %c0_9] : memref<2x20x1xf32, #tpu.memory_space<vmem>>, vector<1x16x1xf32>
    %11 = vector.shape_cast %10 : vector<1x16x1xf32> to vector<16x1xf32>
    %c1_10 = arith.constant 1 : index
    %c0_11 = arith.constant 0 : index
    %c0_12 = arith.constant 0 : index
    %12 = vector.load %arg1[%c1_10, %c0_11, %c0_12] : memref<5x1x16xf32, #tpu.memory_space<vmem>>, vector<1x1x16xf32>
    %13 = vector.shape_cast %12 : vector<1x1x16xf32> to vector<1x16xf32>
    %14 = vector.broadcast %11 : vector<16x1xf32> to vector<16x16xf32>
    %15 = vector.broadcast %13 : vector<1x16xf32> to vector<16x16xf32>
    %16 = arith.mulf %14, %15 : vector<16x16xf32>
    %17 = arith.addf %9, %16 : vector<16x16xf32>
    %c0_13 = arith.constant 0 : index
    %c2 = arith.constant 2 : index
    %c0_14 = arith.constant 0 : index
    %18 = vector.load %arg0[%c0_13, %c2, %c0_14] : memref<2x20x1xf32, #tpu.memory_space<vmem>>, vector<1x16x1xf32>
    %19 = vector.shape_cast %18 : vector<1x16x1xf32> to vector<16x1xf32>
    %c2_15 = arith.constant 2 : index
    %c0_16 = arith.constant 0 : index
    %c0_17 = arith.constant 0 : index
    %20 = vector.load %arg1[%c2_15, %c0_16, %c0_17] : memref<5x1x16xf32, #tpu.memory_space<vmem>>, vector<1x1x16xf32>
    %21 = vector.shape_cast %20 : vector<1x1x16xf32> to vector<1x16xf32>
    %22 = vector.broadcast %19 : vector<16x1xf32> to vector<16x16xf32>
    %23 = vector.broadcast %21 : vector<1x16xf32> to vector<16x16xf32>
    %24 = arith.mulf %22, %23 : vector<16x16xf32>
    %25 = arith.addf %17, %24 : vector<16x16xf32>
    %c0_18 = arith.constant 0 : index
    %c3 = arith.constant 3 : index
    %c0_19 = arith.constant 0 : index
    %26 = vector.load %arg0[%c0_18, %c3, %c0_19] : memref<2x20x1xf32, #tpu.memory_space<vmem>>, vector<1x16x1xf32>
    %27 = vector.shape_cast %26 : vector<1x16x1xf32> to vector<16x1xf32>
    %c3_20 = arith.constant 3 : index
    %c0_21 = arith.constant 0 : index
    %c0_22 = arith.constant 0 : index
    %28 = vector.load %arg1[%c3_20, %c0_21, %c0_22] : memref<5x1x16xf32, #tpu.memory_space<vmem>>, vector<1x1x16xf32>
    %29 = vector.shape_cast %28 : vector<1x1x16xf32> to vector<1x16xf32>
    %30 = vector.broadcast %27 : vector<16x1xf32> to vector<16x16xf32>
    %31 = vector.broadcast %29 : vector<1x16xf32> to vector<16x16xf32>
    %32 = arith.mulf %30, %31 : vector<16x16xf32>
    %33 = arith.addf %25, %32 : vector<16x16xf32>
    %c0_23 = arith.constant 0 : index
    %c4 = arith.constant 4 : index
    %c0_24 = arith.constant 0 : index
    %34 = vector.load %arg0[%c0_23, %c4, %c0_24] : memref<2x20x1xf32, #tpu.memory_space<vmem>>, vector<1x16x1xf32>
    %35 = vector.shape_cast %34 : vector<1x16x1xf32> to vector<16x1xf32>
    %c4_25 = arith.constant 4 : index
    %c0_26 = arith.constant 0 : index
    %c0_27 = arith.constant 0 : index
    %36 = vector.load %arg1[%c4_25, %c0_26, %c0_27] : memref<5x1x16xf32, #tpu.memory_space<vmem>>, vector<1x1x16xf32>
    %37 = vector.shape_cast %36 : vector<1x1x16xf32> to vector<1x16xf32>
    %38 = vector.broadcast %35 : vector<16x1xf32> to vector<16x16xf32>
    %39 = vector.broadcast %37 : vector<1x16xf32> to vector<16x16xf32>
    %40 = arith.mulf %38, %39 : vector<16x16xf32>
    %41 = arith.addf %33, %40 : vector<16x16xf32>
    %42 = vector.broadcast %0 : vector<1x16xf32> to vector<16x16xf32>
    %43 = arith.addf %41, %42 : vector<16x16xf32>
    %cst_28 = arith.constant 0.000000e+00 : f32
    %44 = vector.broadcast %cst_28 : f32 to vector<16x16xf32>
    %45 = arith.maximumf %43, %44 : vector<16x16xf32>
    %46 = tpu.concatenate %1, %45, %1 in 0 : vector<8x16xf32>, vector<16x16xf32>, vector<8x16xf32> -> vector<32x16xf32>
    %47 = vector.extract_strided_slice %46 {offsets = [4, 0], sizes = [24, 16], strides = [1, 1]} : vector<32x16xf32> to vector<24x16xf32>
    %48 = vector.extract_strided_slice %46 {offsets = [5, 0], sizes = [24, 16], strides = [1, 1]} : vector<32x16xf32> to vector<24x16xf32>
    %49 = arith.maximumf %47, %48 : vector<24x16xf32>
    %50 = vector.extract_strided_slice %49 {offsets = [0, 0], sizes = [16, 16], strides = [1, 1]} : vector<24x16xf32> to vector<16x16xf32>
    %51 = vector.extract_strided_slice %49 {offsets = [2, 0], sizes = [16, 16], strides = [1, 1]} : vector<24x16xf32> to vector<16x16xf32>
    %52 = vector.extract_strided_slice %49 {offsets = [4, 0], sizes = [16, 16], strides = [1, 1]} : vector<24x16xf32> to vector<16x16xf32>
    %53 = vector.extract_strided_slice %49 {offsets = [6, 0], sizes = [16, 16], strides = [1, 1]} : vector<24x16xf32> to vector<16x16xf32>
    %54 = vector.extract_strided_slice %49 {offsets = [8, 0], sizes = [16, 16], strides = [1, 1]} : vector<24x16xf32> to vector<16x16xf32>
    %55 = tpu.concatenate %50, %51, %52, %53, %54 in 1 : vector<16x16xf32>, vector<16x16xf32>, vector<16x16xf32>, vector<16x16xf32>, vector<16x16xf32> -> vector<16x80xf32>
    %c1_29 = arith.constant 1 : index
    %c0_30 = arith.constant 0 : index
    %c0_31 = arith.constant 0 : index
    %56 = vector.load %arg0[%c1_29, %c0_30, %c0_31] : memref<2x20x1xf32, #tpu.memory_space<vmem>>, vector<1x16x1xf32>
    %57 = vector.shape_cast %56 : vector<1x16x1xf32> to vector<16x1xf32>
    %c0_32 = arith.constant 0 : index
    %c0_33 = arith.constant 0 : index
    %c0_34 = arith.constant 0 : index
    %58 = vector.load %arg1[%c0_32, %c0_33, %c0_34] : memref<5x1x16xf32, #tpu.memory_space<vmem>>, vector<1x1x16xf32>
    %59 = vector.shape_cast %58 : vector<1x1x16xf32> to vector<1x16xf32>
    %60 = vector.broadcast %57 : vector<16x1xf32> to vector<16x16xf32>
    %61 = vector.broadcast %59 : vector<1x16xf32> to vector<16x16xf32>
    %62 = arith.mulf %60, %61 : vector<16x16xf32>
    %c1_35 = arith.constant 1 : index
    %c1_36 = arith.constant 1 : index
    %c0_37 = arith.constant 0 : index
    %63 = vector.load %arg0[%c1_35, %c1_36, %c0_37] : memref<2x20x1xf32, #tpu.memory_space<vmem>>, vector<1x16x1xf32>
    %64 = vector.shape_cast %63 : vector<1x16x1xf32> to vector<16x1xf32>
    %c1_38 = arith.constant 1 : index
    %c0_39 = arith.constant 0 : index
    %c0_40 = arith.constant 0 : index
    %65 = vector.load %arg1[%c1_38, %c0_39, %c0_40] : memref<5x1x16xf32, #tpu.memory_space<vmem>>, vector<1x1x16xf32>
    %66 = vector.shape_cast %65 : vector<1x1x16xf32> to vector<1x16xf32>
    %67 = vector.broadcast %64 : vector<16x1xf32> to vector<16x16xf32>
    %68 = vector.broadcast %66 : vector<1x16xf32> to vector<16x16xf32>
    %69 = arith.mulf %67, %68 : vector<16x16xf32>
    %70 = arith.addf %62, %69 : vector<16x16xf32>
    %c1_41 = arith.constant 1 : index
    %c2_42 = arith.constant 2 : index
    %c0_43 = arith.constant 0 : index
    %71 = vector.load %arg0[%c1_41, %c2_42, %c0_43] : memref<2x20x1xf32, #tpu.memory_space<vmem>>, vector<1x16x1xf32>
    %72 = vector.shape_cast %71 : vector<1x16x1xf32> to vector<16x1xf32>
    %c2_44 = arith.constant 2 : index
    %c0_45 = arith.constant 0 : index
    %c0_46 = arith.constant 0 : index
    %73 = vector.load %arg1[%c2_44, %c0_45, %c0_46] : memref<5x1x16xf32, #tpu.memory_space<vmem>>, vector<1x1x16xf32>
    %74 = vector.shape_cast %73 : vector<1x1x16xf32> to vector<1x16xf32>
    %75 = vector.broadcast %72 : vector<16x1xf32> to vector<16x16xf32>
    %76 = vector.broadcast %74 : vector<1x16xf32> to vector<16x16xf32>
    %77 = arith.mulf %75, %76 : vector<16x16xf32>
    %78 = arith.addf %70, %77 : vector<16x16xf32>
    %c1_47 = arith.constant 1 : index
    %c3_48 = arith.constant 3 : index
    %c0_49 = arith.constant 0 : index
    %79 = vector.load %arg0[%c1_47, %c3_48, %c0_49] : memref<2x20x1xf32, #tpu.memory_space<vmem>>, vector<1x16x1xf32>
    %80 = vector.shape_cast %79 : vector<1x16x1xf32> to vector<16x1xf32>
    %c3_50 = arith.constant 3 : index
    %c0_51 = arith.constant 0 : index
    %c0_52 = arith.constant 0 : index
    %81 = vector.load %arg1[%c3_50, %c0_51, %c0_52] : memref<5x1x16xf32, #tpu.memory_space<vmem>>, vector<1x1x16xf32>
    %82 = vector.shape_cast %81 : vector<1x1x16xf32> to vector<1x16xf32>
    %83 = vector.broadcast %80 : vector<16x1xf32> to vector<16x16xf32>
    %84 = vector.broadcast %82 : vector<1x16xf32> to vector<16x16xf32>
    %85 = arith.mulf %83, %84 : vector<16x16xf32>
    %86 = arith.addf %78, %85 : vector<16x16xf32>
    %c1_53 = arith.constant 1 : index
    %c4_54 = arith.constant 4 : index
    %c0_55 = arith.constant 0 : index
    %87 = vector.load %arg0[%c1_53, %c4_54, %c0_55] : memref<2x20x1xf32, #tpu.memory_space<vmem>>, vector<1x16x1xf32>
    %88 = vector.shape_cast %87 : vector<1x16x1xf32> to vector<16x1xf32>
    %c4_56 = arith.constant 4 : index
    %c0_57 = arith.constant 0 : index
    %c0_58 = arith.constant 0 : index
    %89 = vector.load %arg1[%c4_56, %c0_57, %c0_58] : memref<5x1x16xf32, #tpu.memory_space<vmem>>, vector<1x1x16xf32>
    %90 = vector.shape_cast %89 : vector<1x1x16xf32> to vector<1x16xf32>
    %91 = vector.broadcast %88 : vector<16x1xf32> to vector<16x16xf32>
    %92 = vector.broadcast %90 : vector<1x16xf32> to vector<16x16xf32>
    %93 = arith.mulf %91, %92 : vector<16x16xf32>
    %94 = arith.addf %86, %93 : vector<16x16xf32>
    %95 = vector.broadcast %0 : vector<1x16xf32> to vector<16x16xf32>
    %96 = arith.addf %94, %95 : vector<16x16xf32>
    %cst_59 = arith.constant 0.000000e+00 : f32
    %97 = vector.broadcast %cst_59 : f32 to vector<16x16xf32>
    %98 = arith.maximumf %96, %97 : vector<16x16xf32>
    %99 = tpu.concatenate %1, %98, %1 in 0 : vector<8x16xf32>, vector<16x16xf32>, vector<8x16xf32> -> vector<32x16xf32>
    %100 = vector.extract_strided_slice %99 {offsets = [4, 0], sizes = [24, 16], strides = [1, 1]} : vector<32x16xf32> to vector<24x16xf32>
    %101 = vector.extract_strided_slice %99 {offsets = [5, 0], sizes = [24, 16], strides = [1, 1]} : vector<32x16xf32> to vector<24x16xf32>
    %102 = arith.maximumf %100, %101 : vector<24x16xf32>
    %103 = vector.extract_strided_slice %102 {offsets = [0, 0], sizes = [16, 16], strides = [1, 1]} : vector<24x16xf32> to vector<16x16xf32>
    %104 = vector.extract_strided_slice %102 {offsets = [2, 0], sizes = [16, 16], strides = [1, 1]} : vector<24x16xf32> to vector<16x16xf32>
    %105 = vector.extract_strided_slice %102 {offsets = [4, 0], sizes = [16, 16], strides = [1, 1]} : vector<24x16xf32> to vector<16x16xf32>
    %106 = vector.extract_strided_slice %102 {offsets = [6, 0], sizes = [16, 16], strides = [1, 1]} : vector<24x16xf32> to vector<16x16xf32>
    %107 = vector.extract_strided_slice %102 {offsets = [8, 0], sizes = [16, 16], strides = [1, 1]} : vector<24x16xf32> to vector<16x16xf32>
    %108 = tpu.concatenate %103, %104, %105, %106, %107 in 1 : vector<16x16xf32>, vector<16x16xf32>, vector<16x16xf32>, vector<16x16xf32>, vector<16x16xf32> -> vector<16x80xf32>
    %109 = tpu.concatenate %55, %108 in 0 : vector<16x80xf32>, vector<16x80xf32> -> vector<32x80xf32>
    %c0_60 = arith.constant 0 : index
    %c0_61 = arith.constant 0 : index
    %110 = vector.load %arg3[%c0_60, %c0_61] : memref<80x32xf32, #tpu.memory_space<vmem>>, vector<80x32xf32>
    %cst_62 = arith.constant dense<0.000000e+00> : vector<32x32xf32>
    %111 = tpu.matmul %109, %110, %cst_62 {dimension_numbers = #tpu.dot_dimension_numbers<[1], [0], [0], [1], [0, 0, 1, 1], [], []>} : vector<32x80xf32>, vector<80x32xf32>, vector<32x32xf32> -> vector<32x32xf32>
    %c0_63 = arith.constant 0 : index
    %c0_64 = arith.constant 0 : index
    %112 = vector.load %arg4[%c0_63, %c0_64] : memref<1x32xf32, #tpu.memory_space<vmem>>, vector<1x32xf32>
    %113 = vector.broadcast %112 : vector<1x32xf32> to vector<32x32xf32>
    %114 = arith.addf %111, %113 : vector<32x32xf32>
    %cst_65 = arith.constant 0.000000e+00 : f32
    %115 = vector.broadcast %cst_65 : f32 to vector<32x32xf32>
    %116 = arith.maximumf %114, %115 : vector<32x32xf32>
    %117 = tpu.concatenate %116, %2 in 0 : vector<32x32xf32>, vector<8x32xf32> -> vector<40x32xf32>
    %118 = vector.extract_strided_slice %117 {offsets = [0, 0], sizes = [32, 32], strides = [1, 1]} : vector<40x32xf32> to vector<32x32xf32>
    %119 = vector.extract_strided_slice %117 {offsets = [2, 0], sizes = [32, 32], strides = [1, 1]} : vector<40x32xf32> to vector<32x32xf32>
    %120 = arith.maximumf %118, %119 : vector<32x32xf32>
    %121 = vector.extract_strided_slice %120 {offsets = [0, 0], sizes = [1, 32], strides = [1, 1]} : vector<32x32xf32> to vector<1x32xf32>
    %122 = vector.extract_strided_slice %120 {offsets = [4, 0], sizes = [1, 32], strides = [1, 1]} : vector<32x32xf32> to vector<1x32xf32>
    %123 = vector.extract_strided_slice %120 {offsets = [8, 0], sizes = [1, 32], strides = [1, 1]} : vector<32x32xf32> to vector<1x32xf32>
    %124 = vector.extract_strided_slice %120 {offsets = [12, 0], sizes = [1, 32], strides = [1, 1]} : vector<32x32xf32> to vector<1x32xf32>
    %125 = tpu.concatenate %121, %122, %123, %124 in 1 : vector<1x32xf32>, vector<1x32xf32>, vector<1x32xf32>, vector<1x32xf32> -> vector<1x128xf32>
    %126 = vector.extract_strided_slice %120 {offsets = [16, 0], sizes = [1, 32], strides = [1, 1]} : vector<32x32xf32> to vector<1x32xf32>
    %127 = vector.extract_strided_slice %120 {offsets = [20, 0], sizes = [1, 32], strides = [1, 1]} : vector<32x32xf32> to vector<1x32xf32>
    %128 = vector.extract_strided_slice %120 {offsets = [24, 0], sizes = [1, 32], strides = [1, 1]} : vector<32x32xf32> to vector<1x32xf32>
    %129 = vector.extract_strided_slice %120 {offsets = [28, 0], sizes = [1, 32], strides = [1, 1]} : vector<32x32xf32> to vector<1x32xf32>
    %130 = tpu.concatenate %126, %127, %128, %129 in 1 : vector<1x32xf32>, vector<1x32xf32>, vector<1x32xf32>, vector<1x32xf32> -> vector<1x128xf32>
    %131 = tpu.concatenate %125, %130 in 0 : vector<1x128xf32>, vector<1x128xf32> -> vector<2x128xf32>
    %c0_66 = arith.constant 0 : index
    %c0_67 = arith.constant 0 : index
    %132 = vector.load %arg5[%c0_66, %c0_67] : memref<128x32xf32, #tpu.memory_space<vmem>>, vector<128x32xf32>
    %cst_68 = arith.constant dense<0.000000e+00> : vector<2x32xf32>
    %133 = tpu.matmul %131, %132, %cst_68 {dimension_numbers = #tpu.dot_dimension_numbers<[1], [0], [0], [1], [0, 0, 1, 1], [], []>} : vector<2x128xf32>, vector<128x32xf32>, vector<2x32xf32> -> vector<2x32xf32>
    %c0_69 = arith.constant 0 : index
    %c0_70 = arith.constant 0 : index
    %134 = vector.load %arg6[%c0_69, %c0_70] : memref<1x32xf32, #tpu.memory_space<vmem>>, vector<1x32xf32>
    %135 = vector.broadcast %134 : vector<1x32xf32> to vector<2x32xf32>
    %136 = arith.addf %133, %135 : vector<2x32xf32>
    %cst_71 = arith.constant 0.000000e+00 : f32
    %137 = vector.broadcast %cst_71 : f32 to vector<2x32xf32>
    %138 = arith.maximumf %136, %137 : vector<2x32xf32>
    %c0_72 = arith.constant 0 : index
    %c0_73 = arith.constant 0 : index
    %139 = vector.load %arg7[%c0_72, %c0_73] : memref<32x2xf32, #tpu.memory_space<vmem>>, vector<32x2xf32>
    %cst_74 = arith.constant dense<0.000000e+00> : vector<2x2xf32>
    %140 = tpu.matmul %138, %139, %cst_74 {dimension_numbers = #tpu.dot_dimension_numbers<[1], [0], [0], [1], [0, 0, 1, 1], [], []>} : vector<2x32xf32>, vector<32x2xf32>, vector<2x2xf32> -> vector<2x2xf32>
    %c0_75 = arith.constant 0 : index
    %c0_76 = arith.constant 0 : index
    %141 = vector.load %arg8[%c0_75, %c0_76] : memref<1x2xf32, #tpu.memory_space<vmem>>, vector<1x2xf32>
    %142 = vector.broadcast %141 : vector<1x2xf32> to vector<2x2xf32>
    %143 = arith.addf %140, %142 : vector<2x2xf32>
    %c0_77 = arith.constant 0 : index
    %c0_78 = arith.constant 0 : index
    %144 = vector.load %arg9[%c0_77, %c0_78] : memref<2x2xf32, #tpu.memory_space<vmem>>, vector<2x2xf32>
    tpu.vector_store %arg9[%c0_77, %c0_78], %143 {strides = array<i32>} : memref<2x2xf32, #tpu.memory_space<vmem>>, vector<2x2xf32>,
    return
  }
}

</mosaic_0001>

<bundles_post_ra>
// kernel: tpu_custom_call.1
= control target key start
LH: loop header
LB: loop body
LE: loop exit
PB: predicated region body
PF: predicated region fallthrough
CT: control target
= control target key end

     0   :  { %v970_v2 = vmov 0   ;;  %s1372_s0 = inlined_call_operand.vmem [shape: f32[2,20,1], index: 0, kind: input, shape index: {}]   ;;  %s1373_s1 = inlined_call_operand.vmem [shape: f32[5,1,16], index: 1, kind: input, shape index: {}]   ;;  %s1374_s2 = inlined_call_operand.vmem [shape: f32[1,16], index: 2, kind: input, shape index: {}]   ;;  %s1375_s3 = inlined_call_operand.vmem [shape: f32[80,32], index: 3, kind: input, shape index: {}]   ;;  %s1376_s4 = inlined_call_operand.vmem [shape: f32[1,32], index: 4, kind: input, shape index: {}]   ;;  %s1377_s5 = inlined_call_operand.vmem [shape: f32[128,32], index: 5, kind: input, shape index: {}]   ;;  %s1378_s6 = inlined_call_operand.vmem [shape: f32[1,32], index: 6, kind: input, shape index: {}]   ;;  %s1379_s7 = inlined_call_operand.vmem [shape: f32[32,2], index: 7, kind: input, shape index: {}]   ;;  %s1380_s8 = inlined_call_operand.vmem [shape: f32[1,2], index: 8, kind: input, shape index: {}]   ;;  %s1381_s9 = inlined_call_operand.hbm [shape: f32[2,2], index: 9, kind: output, shape index: {}]  }
   0x1   :  { %v55_v0 = vld [vmem:[%s1372_s0 + $0x1] sm:$0xff]  ;;  %937 = vset.pattern.permute.xlu1 %v970_v2  ;;  %936 = vset.pattern.permute.xlu0 %v970_v2  ;;  %v56_v3 = vld [vmem:[%s1372_s0 + $0x9] sm:$0xff] }
   0x2   :  { %v34_v1 = vld [vmem:[%s1372_s0] sm:$0xff]  ;;  %61 = vperm.xlu1 %937, %v55_v0   ;;  %v35_v4 = vld [vmem:[%s1372_s0 + $0x8] sm:$0xff] }
   0x3   :  { %39 = vperm.xlu0 %936, %v34_v1   ;;  %v80_v5 = vld [vmem:[%s1372_s0 + $0xa] sm:$0xff]  ;;  %v79_v6 = vld [vmem:[%s1372_s0 + $0x2] sm:$0xff] }
   0x6   :  { %66 = vperm.xlu1 %937, %v56_v3  }
   0x7   :  { %44 = vperm.xlu0 %936, %v35_v4  }
   0x8   :  { %14 = vsyncpa [#allocation3], 0  ;;  %v104_v7 = vld [vmem:[%s1372_s0 + $0xb] sm:$0xff]  ;;  %v103_v8 = vld [vmem:[%s1372_s0 + $0x3] sm:$0xff]  ;;  %v971_v13 = vmov 0.0   ;;  %s972_s28 = smov 64  }
   0x9   :  { %v802_v9 = vld [vmem:[%s1372_s0 + $0x20] sm:$0xff]  ;;  %v801_v10 = vld [vmem:[%s1372_s0 + $0x18] sm:$0xff]  ;;  %881 = vmatprep.subr.mxu1 %v971_v13  ;;  %v128_v14 = vld [vmem:[%s1372_s0 + $0xc] sm:$0xff]  ;;  %v1085_v20 = vrot.slane %v971_v13, 1  ;;  %vm164_vm0 = vcmask 1046528   ;;  %s973_s21 = smov 16  }
   0xa   :  { %90 = vperm.xlu1 %937, %v80_v5   ;;  %v804_v11 = vld [vmem:[%s1372_s0 + $0x21] sm:$0xff]  ;;  %v803_v12 = vld [vmem:[%s1372_s0 + $0x19] sm:$0xff]  ;;  %s974_s22 = smov 32   ;;  %s975_s27 = smov 48   ;;  %vm182_vm1 = vcmask 1045504   ;;  %vm211_vm2 = vcmask 1041408  }
   0xb   :  { %85 = vperm.xlu0 %936, %v79_v6   ;;  %v127_v15 = vld [vmem:[%s1372_s0 + $0x4] sm:$0xff]  ;;  %v805_v17 = vld [vmem:[%s1372_s0 + $0x1a] sm:$0xff]  ;;  %v178_v23 = vmax.f32 %v1085_v20, 0.0  ;;  %v795_v34 = vld [vmem:[%s1373_s1 + $0x2] ss:$0 sm:$0xff]  ;;  %vm197_vm3 = vcmask 1043456  }
   0xc   :  { %v806_v16 = vld [vmem:[%s1372_s0 + $0x22] sm:$0xff]  ;;  %v793_v32 = vld [vmem:[%s1373_s1 + $0x1] ss:$0 sm:$0xff]  ;;  %v791_v33 = vld [vmem:[%s1373_s1] ss:$0 sm:$0xff]  ;;  %vm235_vm4 = vcmask 130048  }
   0xd   :  { %v808_v18 = vld [vmem:[%s1372_s0 + $0x23] sm:$0xff]  ;;  %v807_v19 = vld [vmem:[%s1372_s0 + $0x1b] sm:$0xff]  ;;  %vm243_vm5 = vcmask 392192   ;;  %vm239_vm6 = vcmask 261120   ;;  %vm247_vm7 = vcmask 523264   ;;  %vm440_vm8 = vcmask 654336  }
   0xe   :  { %114 = vperm.xlu1 %937, %v104_v7   ;;  %v810_v21 = vld [vmem:[%s1372_s0 + $0x24] sm:$0xff]  ;;  %v809_v22 = vld [vmem:[%s1372_s0 + $0x1c] sm:$0xff]  ;;  %vm976_vm9 = vmmov 0   ;;  %vm574_vm10 = vcmask 785408   ;;  %vm595_vm11 = vcmask 1040384   ;;  %s978_s16 = smov [#allocation2]  }
   0xf   :  { %109 = vperm.xlu0 %936, %v103_v8   ;;  %v797_v41 = vld [vmem:[%s1373_s1 + $0x3] ss:$0 sm:$0xff]  ;;  %v799_v50 = vld [vmem:[%s1373_s1 + $0x4] ss:$0 sm:$0xff]  ;;  %v800_v59 = vld [vmem:[%s1374_s2] ss:$0 sm:$0xff]  ;;  %913 = vmatprep.mubr.msk.f32.mxu1 %vm976_vm9, %v971_v13 }
  0x10   :  { %vm775_vm12 = vcmask 9216  }
  0x12   :  { %261 = vperm.xlu1 %937, %v802_v9  }
  0x13   :  { %256 = vperm.xlu0 %936, %v801_v10  }
  0x16   :  { %275 = vperm.xlu1 %937, %v804_v11  }
  0x17   :  { %270 = vperm.xlu0 %936, %v803_v12  }
  0x1a   :  { %138 = vperm.xlu1 %937, %v128_v14  }
  0x1b   :  { %133 = vperm.xlu0 %936, %v127_v15  }
  0x1e   :  { %291 = vperm.xlu1 %937, %v806_v16  }
  0x1f   :  { %286 = vperm.xlu0 %936, %v805_v17  }
  0x22   :  { %307 = vperm.xlu1 %937, %v808_v18  }
  0x23   :  { %302 = vperm.xlu0 %936, %v807_v19  }
  0x26   :  { %323 = vperm.xlu1 %937, %v810_v21  }
  0x27   :  { %318 = vperm.xlu0 %936, %v809_v22  }
  0x2a   :  { %230 = vrot.lane.b32.xlu1 %v178_v23, %s972_s28 }
  0x7d   :  { %v62_v24 = vpop.permute.xlu1 %61 }
  0x7e   :  { %v40_v25 = vpop.permute.xlu0 %39  ;;  %v75_v37 = vmul.f32 %v793_v32, %v62_v24 }
  0x7f   :  { %v53_v38 = vmul.f32 %v791_v33, %v40_v25 }
  0x81   :  { %v67_v26 = vpop.permute.xlu1 %66  ;;  %v77_v46 = vadd.f32 %v75_v37, %v53_v38  ;;  %v431_v38 = vld [vmem:[%s1375_s3 + $0x40] sm:$0xff] }
  0x82   :  { %v45_v27 = vpop.permute.xlu0 %44  ;;  %v76_v39 = vmul.f32 %v793_v32, %v67_v26 }
  0x83   :  { %v54_v40 = vmul.f32 %v791_v33, %v45_v27 }
  0x85   :  { %v91_v28 = vpop.permute.xlu1 %90  ;;  %v78_v47 = vadd.f32 %v76_v39, %v54_v40 }
  0x86   :  { %v86_v29 = vpop.permute.xlu0 %85  ;;  %v100_v42 = vmul.f32 %v795_v34, %v91_v28 }
  0x87   :  { %v99_v43 = vmul.f32 %v795_v34, %v86_v29 }
  0x88   :  { %v102_v51 = vadd.f32 %v100_v42, %v78_v47 }
  0x89   :  { %v115_v30 = vpop.permute.xlu1 %114  ;;  %v101_v52 = vadd.f32 %v99_v43, %v77_v46  ;;  %v430_v43 = vld [vmem:[%s1375_s3 + $0x38] sm:$0xff] }
  0x8a   :  { %v110_v31 = vpop.permute.xlu0 %109  ;;  %v124_v48 = vmul.f32 %v797_v41, %v115_v30 }
  0x8b   :  { %v123_v49 = vmul.f32 %v797_v41, %v110_v31 }
  0x8c   :  { %v126_v55 = vadd.f32 %v124_v48, %v102_v51  ;;  %v429_v48 = vld [vmem:[%s1375_s3 + $0x30] sm:$0xff] }
  0x8d   :  { %v262_v35 = vpop.permute.xlu1 %261  ;;  %v125_v56 = vadd.f32 %v123_v49, %v101_v52 }
  0x8e   :  { %v257_v36 = vpop.permute.xlu0 %256  ;;  %v265_v4 = vmul.f32 %v791_v33, %v262_v35  ;;  %v432_v35 = vld [vmem:[%s1375_s3 + $0x48] sm:$0xff] }
  0x8f   :  { %v264_v5 = vmul.f32 %v791_v33, %v257_v36  ;;  %855 = vmatprep.subr.mxu0 %v432_v35 }
  0x90   :  { %856 = vmatpush3.msra.mxu0 %v432_v35 }
  0x91   :  { %v276_v44 = vpop.permute.xlu1 %275  ;;  %857 = vmatprep.subr.mxu0 %v431_v38 }
  0x92   :  { %v271_v45 = vpop.permute.xlu0 %270  ;;  %v279_v62 = vmul.f32 %v793_v32, %v276_v44  ;;  %858 = vmatpush3.msra.mxu0 %v431_v38 }
  0x93   :  { %v278_v63 = vmul.f32 %v793_v32, %v271_v45  ;;  %859 = vmatprep.subr.mxu0 %v430_v43 }
  0x94   :  { %v281_v10 = vadd.f32 %v279_v62, %v265_v4  ;;  %860 = vmatpush3.msra.mxu0 %v430_v43 }
  0x95   :  { %v139_v53 = vpop.permute.xlu1 %138  ;;  %v280_v11 = vadd.f32 %v278_v63, %v264_v5  ;;  %861 = vmatprep.subr.mxu0 %v429_v48 }
  0x96   :  { %v134_v54 = vpop.permute.xlu0 %133  ;;  %v148_v57 = vmul.f32 %v799_v50, %v139_v53  ;;  %862 = vmatpush3.msra.mxu0 %v429_v48 }
  0x97   :  { %v147_v58 = vmul.f32 %v799_v50, %v134_v54  ;;  %v428_v54 = vld [vmem:[%s1375_s3 + $0x28] sm:$0xff] }
  0x98   :  { %v150_v60 = vadd.f32 %v148_v57, %v126_v55  ;;  %863 = vmatprep.subr.mxu0 %v428_v54  ;;  %v427_v57 = vld [vmem:[%s1375_s3 + $0x20] sm:$0xff] }
  0x99   :  { %v149_v61 = vadd.f32 %v147_v58, %v125_v56  ;;  %v292_v0 = vpop.permute.xlu1 %291  ;;  %864 = vmatpush3.msra.mxu0 %v428_v54 }
  0x9a   :  { %v287_v1 = vpop.permute.xlu0 %286  ;;  %v158_v2 = vadd.f32 %v800_v59, %v150_v60  ;;  %v295_v8 = vmul.f32 %v795_v34, %v292_v0  ;;  %865 = vmatprep.subr.mxu0 %v427_v57  ;;  %v425_v0 = vld [vmem:[%s1375_s3 + $0x10] sm:$0xff] }
  0x9b   :  { %v157_v3 = vadd.f32 %v800_v59, %v149_v61  ;;  %v294_v9 = vmul.f32 %v795_v34, %v287_v1  ;;  %866 = vmatpush3.msra.mxu0 %v427_v57  ;;  %v424_v1 = vld [vmem:[%s1375_s3 + $0x8] sm:$0xff] }
  0x9c   :  { %v160_v6 = vmax.f32 %v158_v2, 0.0  ;;  %v297_v22 = vadd.f32 %v295_v8, %v281_v10 }
  0x9d   :  { %v159_v7 = vmax.f32 %v157_v3, 0.0  ;;  %v308_v12 = vpop.permute.xlu1 %307  ;;  %v296_v24 = vadd.f32 %v294_v9, %v280_v11 }
  0x9e   :  { %v303_v14 = vpop.permute.xlu0 %302  ;;  %v168_v15 = vrot.slane %v160_v6, 1  ;;  %v311_v17 = vmul.f32 %v797_v41, %v308_v12 }
  0x9f   :  { %v166_v16 = vrot.slane %v159_v7, 1  ;;  %v310_v18 = vmul.f32 %v797_v41, %v303_v14 }
  0xa0   :  { %v170_v19 = vsel %vm164_vm0, %v168_v15, %v1085_v20  ;;  %v313_v29 = vadd.f32 %v311_v17, %v297_v22 }
  0xa1   :  { %v169_v21 = vsel %vm164_vm0, %v166_v16, %v168_v15  ;;  %v1118_v25 = vmax.f32 %v160_v6, %v170_v19  ;;  %v324_v27 = vpop.permute.xlu1 %323  ;;  %v312_v30 = vadd.f32 %v310_v18, %v296_v24  ;;  %v1157_v53 = vsel %vm164_vm0, %v1085_v20, %v166_v16  ;;  %v423_v6 = vld [vmem:[%s1375_s3] sm:$0xff] }
  0xa2   :  { %v1120_v26 = vmax.f32 %v159_v7, %v169_v21  ;;  %v319_v28 = vpop.permute.xlu0 %318  ;;  %v327_v31 = vmul.f32 %v799_v50, %v324_v27  ;;  %v175_v58 = vmax.f32 %v1157_v53, 0.0  ;;  %v215_v7 = vrot.slane %v178_v23, 6 }
  0xa3   :  { %v326_v32 = vmul.f32 %v799_v50, %v319_v28  ;;  %228 = vrot.lane.b32.xlu0 %v1118_v25, %s972_s28  ;;  %v186_v36 = vrot.slane %v1118_v25, 2  ;;  %v199_v45 = vrot.slane %v1118_v25, 4  ;;  %v213_v4 = vrot.slane %v1118_v25, 6 }
  0xa4   :  { %226 = vrot.lane.b32.xlu1 %v1120_v26, %s972_s28  ;;  %v329_v33 = vadd.f32 %v327_v31, %v313_v29  ;;  %v198_v37 = vrot.slane %v1120_v26, 4  ;;  %v212_v44 = vrot.slane %v1120_v26, 6  ;;  %v184_v62 = vrot.slane %v1120_v26, 2 }
  0xa5   :  { %v328_v34 = vadd.f32 %v326_v32, %v312_v30  ;;  %v183_v63 = vrot.slane %v175_v58, 2  ;;  %v216_v23 = vsel %vm211_vm2, %v213_v4, %v215_v7  ;;  %v231_v19 = vpop.permute.xlu1 %230 }
  0xa6   :  { %v331_v39 = vadd.f32 %v800_v59, %v329_v33  ;;  %v187_v2 = vsel %vm182_vm1, %v184_v62, %v186_v36  ;;  %v214_v8 = vsel %vm211_vm2, %v212_v44, %v213_v4  ;;  %v200_v9 = vsel %vm197_vm3, %v198_v37, %v199_v45 }
  0xa7   :  { %v330_v40 = vadd.f32 %v800_v59, %v328_v34  ;;  %192 = vrot.lane.b32.xlu0 %v186_v36, %s973_s21  ;;  %v426_v59 = vld [vmem:[%s1375_s3 + $0x18] sm:$0xff]  ;;  %v185_v3 = vsel %vm182_vm1, %v183_v63, %v184_v62 }
  0xa8   :  { %201 = vrot.lane.b32.xlu1 %v198_v37, %s974_s22  ;;  %v333_v41 = vmax.f32 %v331_v39, 0.0  ;;  %867 = vmatprep.subr.mxu0 %v426_v59 }
  0xa9   :  { %v332_v42 = vmax.f32 %v330_v40, 0.0  ;;  %868 = vmatpush3.msra.mxu0 %v426_v59 }
  0xaa   :  { %v338_v46 = vrot.slane %v333_v41, 1  ;;  %869 = vmatprep.subr.mxu0 %v425_v0 }
  0xab   :  { %v336_v47 = vrot.slane %v332_v42, 1  ;;  %217 = vrot.lane.b32.xlu0 %v212_v44, %s975_s27  ;;  %870 = vmatpush3.msra.mxu0 %v425_v0 }
  0xac   :  { %205 = vrot.lane.b32.xlu1 %v199_v45, %s974_s22  ;;  %v340_v49 = vsel %vm164_vm0, %v338_v46, %v1085_v20  ;;  %871 = vmatprep.subr.mxu0 %v424_v1 }
  0xad   :  { %v339_v50 = vsel %vm164_vm0, %v336_v47, %v338_v46  ;;  %v1151_v51 = vmax.f32 %v333_v41, %v340_v49  ;;  %v1193_v5 = vsel %vm164_vm0, %v1085_v20, %v336_v47  ;;  %872 = vmatpush3.msra.mxu0 %v424_v1 }
  0xae   :  { %v1153_v52 = vmax.f32 %v332_v42, %v339_v50  ;;  %v344_v11 = vmax.f32 %v1193_v5, 0.0  ;;  %873 = vmatprep.subr.mxu0 %v423_v6 }
  0xaf   :  { %v353_v55 = vrot.slane %v1151_v51, 2  ;;  %v365_v61 = vrot.slane %v1151_v51, 4  ;;  %874 = vmatpush3.msra.mxu0 %v423_v6  ;;  %v377_v12 = vrot.slane %v1151_v51, 6 }
  0xb0   :  { %v364_v56 = vrot.slane %v1153_v52, 4  ;;  %v376_v60 = vrot.slane %v1153_v52, 6  ;;  %v351_v10 = vrot.slane %v1153_v52, 2  ;;  %916 = vmatprep.subr.mxu0 %v971_v13  ;;  %v350_v14 = vrot.slane %v344_v11, 2 }
  0xb1   :  { %359 = vrot.lane.b32.xlu0 %v353_v55, %s973_s21  ;;  %v379_v18 = vsel %vm211_vm2, %v377_v12, %v215_v7 }
  0xb2   :  { %367 = vrot.lane.b32.xlu1 %v364_v56, %s974_s22  ;;  %v354_v20 = vsel %vm182_vm1, %v351_v10, %v353_v55  ;;  %v378_v15 = vsel %vm211_vm2, %v376_v60, %v377_v12  ;;  %v352_v16 = vsel %vm182_vm1, %v350_v14, %v351_v10  ;;  %v366_v17 = vsel %vm197_vm3, %v364_v56, %v365_v61  ;;  %v612_v12 = vld [vmem:[%s1377_s5 + $0x78] sm:$0xff]  ;;  %v611_v14 = vld [vmem:[%s1377_s5 + $0x70] sm:$0xff] }
  0xb3   :  { %882 = vmatpush3.msra.mxu1 %v612_v12 }
  0xb4   :  { %883 = vmatprep.subr.mxu1 %v971_v13 }
  0xb5   :  { %380 = vrot.lane.b32.xlu0 %v376_v60, %s975_s27  ;;  %884 = vmatpush3.msra.mxu1 %v611_v14 }
  0xb6   :  { %371 = vrot.lane.b32.xlu1 %v365_v61, %s974_s22  ;;  %885 = vmatprep.subr.mxu1 %v971_v13 }
  0xb9   :  { %188 = vrot.lane.b32.xlu0 %v185_v3, %s973_s21 }
  0xba   :  { %190 = vrot.lane.b32.xlu1 %v187_v2, %s973_s21 }
  0xbd   :  { %203 = vrot.lane.b32.xlu0 %v200_v9, %s974_s22 }
  0xbe   :  { %219 = vrot.lane.b32.xlu1 %v214_v8, %s975_s27 }
  0xc1   :  { %221 = vrot.lane.b32.xlu0 %v216_v23, %s975_s27 }
  0xc2   :  { %357 = vrot.lane.b32.xlu1 %v354_v20, %s973_s21 }
  0xc5   :  { %355 = vrot.lane.b32.xlu0 %v352_v16, %s973_s21  ;;  %v609_v16 = vld [vmem:[%s1377_s5 + $0x60] sm:$0xff] }
  0xc6   :  { %382 = vrot.lane.b32.xlu1 %v378_v15, %s975_s27  ;;  %v610_v15 = vld [vmem:[%s1377_s5 + $0x68] sm:$0xff] }
  0xc7   :  { %886 = vmatpush3.msra.mxu1 %v610_v15 }
  0xc8   :  { %887 = vmatprep.subr.mxu1 %v971_v13 }
  0xc9   :  { %369 = vrot.lane.b32.xlu0 %v366_v17, %s974_s22  ;;  %v608_v17 = vld [vmem:[%s1377_s5 + $0x58] sm:$0xff]  ;;  %888 = vmatpush3.msra.mxu1 %v609_v16  ;;  %v692_v16 = vld [vmem:[%s1379_s7 + $0x8] sm:$0xff] }
  0xca   :  { %389 = vrot.lane.b32.xlu1 %v1153_v52, %s972_s28  ;;  %889 = vmatprep.subr.mxu1 %v971_v13 }
  0xcb   :  { %890 = vmatpush3.msra.mxu1 %v608_v17  ;;  %v691_v17 = vld [vmem:[%s1379_s7] sm:$0xff] }
  0xcc   :  { %891 = vmatprep.subr.mxu1 %v971_v13 }
  0xcd   :  { %384 = vrot.lane.b32.xlu0 %v379_v18, %s975_s27  ;;  %v607_v18 = vld [vmem:[%s1377_s5 + $0x50] sm:$0xff] }
  0xce   :  { %892 = vmatpush3.msra.mxu1 %v607_v18  ;;  %v816_v18 = vld [vmem:[%s1378_s6] ss:$0 sm:$0xff] }
  0xcf   :  { %893 = vmatprep.subr.mxu1 %v971_v13 }
  0xd1   :  { %391 = vrot.lane.b32.xlu0 %v1151_v51, %s972_s28 }
 0x115   :  { %v229_v21 = vpop.permute.xlu0 %228 }
 0x116   :  { %v227_v22 = vpop.permute.xlu1 %226 }
 0x119   :  { %v193_v24 = vpop.permute.xlu0 %192 }
 0x11a   :  { %v202_v27 = vpop.permute.xlu1 %201  ;;  %v238_v45 = vsel %vm235_vm4, %v1118_v25, %v193_v24  ;;  %v603_v24 = vld [vmem:[%s1377_s5 + $0x30] sm:$0xff] }
 0x11d   :  { %v218_v28 = vpop.permute.xlu0 %217 }
 0x11e   :  { %v206_v29 = vpop.permute.xlu1 %205 }
 0x11f   :  { %v242_v47 = vsel %vm239_vm6, %v238_v45, %v206_v29 }
 0x123   :  { %v360_v30 = vpop.permute.xlu0 %359 }
 0x124   :  { %v368_v31 = vpop.permute.xlu1 %367  ;;  %v397_v62 = vsel %vm235_vm4, %v1151_v51, %v360_v30  ;;  %v811_v30 = vld [vmem:[%s1376_s4] ss:$0 sm:$0xff] }
 0x127   :  { %v381_v32 = vpop.permute.xlu0 %380 }
 0x128   :  { %v372_v33 = vpop.permute.xlu1 %371 }
 0x129   :  { %v400_v63 = vsel %vm239_vm6, %v397_v62, %v372_v33 }
 0x12b   :  { %v189_v35 = vpop.permute.xlu0 %188 }
 0x12c   :  { %v191_v34 = vpop.permute.xlu1 %190  ;;  %v236_v36 = vsel %vm235_vm4, %v175_v58, %v189_v35 }
 0x12d   :  { %v240_v37 = vsel %vm239_vm6, %v236_v36, %v202_v27  ;;  %v237_v39 = vsel %vm235_vm4, %v1120_v26, %v191_v34  ;;  %v602_v27 = vld [vmem:[%s1377_s5 + $0x28] sm:$0xff] }
 0x12e   :  { %v244_v38 = vsel %vm243_vm5, %v240_v37, %v218_v28 }
 0x12f   :  { %v204_v41 = vpop.permute.xlu0 %203  ;;  %v248_v43 = vsel %vm247_vm7, %v244_v38, %v227_v22  ;;  %v604_v22 = vld [vmem:[%s1377_s5 + $0x38] sm:$0xff]  ;;  %v601_v38 = vld [vmem:[%s1377_s5 + $0x20] sm:$0xff] }
 0x130   :  { %v220_v40 = vpop.permute.xlu1 %219  ;;  %v241_v42 = vsel %vm239_vm6, %v237_v39, %v204_v41  ;;  %v410_v50 = vrot.slane %v248_v43, 4 }
 0x131   :  { %v245_v44 = vsel %vm243_vm5, %v241_v42, %v220_v40  ;;  %v549_v42 = vrot.slane %v971_v13, 2 }
 0x132   :  { %v249_v46 = vsel %vm247_vm7, %v245_v44, %v229_v21  ;;  %v605_v21 = vld [vmem:[%s1377_s5 + $0x40] sm:$0xff]  ;;  %v600_v44 = vld [vmem:[%s1377_s5 + $0x18] sm:$0xff] }
 0x133   :  { %v222_v49 = vpop.permute.xlu0 %221  ;;  %v411_v53 = vrot.slane %v249_v46, 4 }
 0x134   :  { %v358_v48 = vpop.permute.xlu1 %357  ;;  %v246_v26 = vsel %vm243_vm5, %v242_v47, %v222_v49 }
 0x135   :  { %v250_v54 = vsel %vm247_vm7, %v246_v26, %v231_v19  ;;  %v412_v55 = vsel %vm197_vm3, %v410_v50, %v411_v53  ;;  %v396_v0 = vsel %vm235_vm4, %v1153_v52, %v358_v48  ;;  %v599_v50 = vld [vmem:[%s1377_s5 + $0x10] sm:$0xff]  ;;  %v598_v26 = vld [vmem:[%s1377_s5 + $0x8] sm:$0xff] }
 0x136   :  { %v413_v56 = vrot.slane %v250_v54, 4  ;;  %875 = vmatprep.mubr.msk.f32.mxu0 %vm440_vm8, %v412_v55 }
 0x137   :  { %v356_v57 = vpop.permute.xlu0 %355 }
 0x138   :  { %v414_v25 = vsel %vm197_vm3, %v411_v53, %v413_v56  ;;  %v383_v58 = vpop.permute.xlu1 %382  ;;  %v395_v59 = vsel %vm235_vm4, %v344_v11, %v356_v57  ;;  %v597_v56 = vld [vmem:[%s1377_s5] sm:$0xff] }
 0x139   :  { %876 = vmatmul.mubr.msk.f32.vlgmr.msra.gmra.mxu0 %vm440_vm8, %v414_v25  ;;  %v398_v61 = vsel %vm239_vm6, %v395_v59, %v368_v31  ;;  %v694_v59 = vld [vmem:[%s1379_s7 + $0x18] sm:$0xff] }
 0x13a   :  { %v401_v2 = vsel %vm243_vm5, %v398_v61, %v381_v32  ;;  %917 = vmatpush3.msra.mxu0 %v694_v59 }
 0x13b   :  { %v370_v60 = vpop.permute.xlu0 %369  ;;  %918 = vmatprep.subr.mxu0 %v971_v13 }
 0x13c   :  { %v390_v1 = vpop.permute.xlu1 %389  ;;  %v399_v4 = vsel %vm239_vm6, %v396_v0, %v370_v60  ;;  %v693_v60 = vld [vmem:[%s1379_s7 + $0x10] sm:$0xff]  ;;  %s783_s7 = sshll.u32 %s978_s16, 4  ;;  %s784_s7 = int_to_ptr.vmem [resolvable:$true] %s783_s7 }
 0x13d   :  { %v404_v6 = vsel %vm247_vm7, %v401_v2, %v390_v1  ;;  %v402_v8 = vsel %vm243_vm5, %v399_v4, %v383_v58  ;;  %919 = vmatpush3.msra.mxu0 %v693_v60  ;;  %s948_s17 = scalar_lea.vmem %s784_s7, 32  ;;  %p953_p1 = scmp.lt.s32.totalorder %s784_s7, %s784_s7 }
 0x13e   :  { %v418_v10 = vrot.slane %v404_v6, 4  ;;  %920 = vmatprep.subr.mxu0 %v971_v13  ;;  %p949_p0 = scmp.ne.s32.totalorder %s784_s7, %s948_s17  ;;  %p954_p2 = scmp.lt.s32.totalorder %s948_s17, %s948_s17 }
 0x13f   :  { %v385_v3 = vpop.permute.xlu0 %384  ;;  %921 = vmatpush3.msra.mxu0 %v692_v16 }
 0x140   :  { %v403_v5 = vsel %vm243_vm5, %v400_v63, %v385_v3  ;;  %922 = vmatprep.subr.mxu0 %v971_v13  ;;  %p955_p3 = por %p954_p2, %p953_p1 }
 0x141   :  { %v406_v7 = vsel %vm247_vm7, %v403_v5, %v231_v19  ;;  %v606_v19 = vld [vmem:[%s1377_s5 + $0x48] sm:$0xff]  ;;  %s977_s5 = smov 96   ;;  %923 = vmatpush3.msra.mxu0 %v691_v17 }
 0x142   :  { %v421_v11 = vrot.slane %v406_v7, 4  ;;  %894 = vmatpush3.msra.mxu1 %v606_v19  ;;  %p956_p4 = pnand %p955_p3, %p949_p0 }
 0x143   :  { %v392_v51 = vpop.permute.xlu0 %391  ;;  %895 = vmatprep.subr.mxu1 %v971_v13 }
 0x144   :  { %v405_v9 = vsel %vm247_vm7, %v402_v8, %v392_v51  ;;  %896 = vmatpush3.msra.mxu1 %v605_v21 }
 0x145   :  { %v419_v52 = vrot.slane %v405_v9, 4  ;;  %897 = vmatprep.subr.mxu1 %v971_v13 }
 0x146   :  { %898 = vmatpush3.msra.mxu1 %v604_v22 }
 0x147   :  { %v420_v20 = vsel %vm197_vm3, %v418_v10, %v419_v52  ;;  %v422_v23 = vsel %vm197_vm3, %v419_v52, %v421_v11  ;;  %899 = vmatprep.subr.mxu1 %v971_v13 }
 0x148   :  { %878 = vmatprep.mubr.msk.f32.mxu0 %vm440_vm8, %v420_v20  ;;  %900 = vmatpush3.msra.mxu1 %v603_v24 }
 0x149   :  { %879 = vmatmul.mubr.msk.f32.gmra.mxu0 %vm440_vm8, %v422_v23  ;;  %901 = vmatprep.subr.mxu1 %v971_v13 }
 0x14a   :  { %902 = vmatpush3.msra.mxu1 %v602_v27  ;;  %924 = vmatprep.mubr.msk.f32.mxu0 %vm976_vm9, %v971_v13  ;;  %v817_v27 = vld [vmem:[%s1380_s8] ss:$0 sm:$0xff] }
 0x14b   :  { %903 = vmatprep.subr.mxu1 %v971_v13 }
 0x14c   :  { %904 = vmatpush3.msra.mxu1 %v601_v38 }
 0x14d   :  { %905 = vmatprep.subr.mxu1 %v971_v13 }
 0x14e   :  { %906 = vmatpush3.msra.mxu1 %v600_v44 }
 0x14f   :  { %907 = vmatprep.subr.mxu1 %v971_v13 }
 0x150   :  { %908 = vmatpush3.msra.mxu1 %v599_v50 }
 0x151   :  { %909 = vmatprep.subr.mxu1 %v971_v13 }
 0x152   :  { %910 = vmatpush3.msra.mxu1 %v598_v26 }
 0x153   :  { %911 = vmatprep.subr.mxu1 %v971_v13 }
 0x154   :  { %912 = vmatpush3.msra.mxu1 %v597_v56 }
 0x1f9   :  { %v877_v28 = vpop.f32.mrf.mxu0 }
 0x1fa   :  { %v521_v32 = vadd.f32 %v877_v28, %v811_v30 }
 0x1fb   :  { %v515_v29 = vpop.f32.mrf.mxu0 }
 0x1fc   :  { %v516_v31 = vadd.f32 %v811_v30, %v515_v29  ;;  %v535_v34 = vmax.f32 %v521_v32, 0.0 }
 0x1fe   :  { %v534_v33 = vmax.f32 %v516_v31, 0.0  ;;  %v543_v40 = vrot.slane %v535_v34, 2 }
 0x200   :  { %v542_v36 = vrot.slane %v534_v33, 2 }
 0x202   :  { %v544_v45 = vsel %vm182_vm1, %v542_v36, %v543_v40 }
 0x203   :  { %v555_v53 = vmax.f32 %v534_v33, %v544_v45 }
 0x205   :  { %v560_v61 = vrot.slane %v555_v53, 4 }
 0x209   :  { %v880_v35 = vpop.f32.mrf.mxu0 }
 0x20a   :  { %v531_v37 = vadd.f32 %v880_v35, %v811_v30 }
 0x20b   :  { %v525_v39 = vpop.f32.mrf.mxu0 }
 0x20c   :  { %v537_v41 = vmax.f32 %v531_v37, 0.0  ;;  %v526_v43 = vadd.f32 %v811_v30, %v525_v39 }
 0x20e   :  { %v547_v46 = vrot.slane %v537_v41, 2  ;;  %v536_v47 = vmax.f32 %v526_v43, 0.0 }
 0x210   :  { %v550_v48 = vsel %vm182_vm1, %v547_v46, %v549_v42  ;;  %v545_v49 = vrot.slane %v536_v47, 2 }
 0x211   :  { %v558_v57 = vmax.f32 %v537_v41, %v550_v48 }
 0x212   :  { %v548_v54 = vsel %vm182_vm1, %v545_v49, %v547_v46  ;;  %v546_v55 = vsel %vm182_vm1, %v543_v40, %v545_v49 }
 0x213   :  { %v557_v25 = vmax.f32 %v536_v47, %v548_v54  ;;  %v556_v58 = vmax.f32 %v535_v34, %v546_v55  ;;  %v585_v2 = vrot.slane %v558_v57, 4 }
 0x215   :  { %v577_v62 = vrot.slane %v557_v25, 4  ;;  %v938_v63 = vpack.i.bf16 %v556_v58, %v558_v57  ;;  %v568_v1 = vrot.slane %v556_v58, 4 }
 0x217   :  { %939 = vrot.lane.b32.xlu0 %v938_v63, %s972_s28  ;;  %v943_v0 = vpack.i.bf16 %v560_v61, %v577_v62 }
 0x219   :  { %944 = vrot.lane.b32.xlu1 %v943_v0, %s974_s22 }
 0x21b   :  { %569 = vrot.lane.b32.xlu0 %v568_v1, %s977_s5 }
 0x21d   :  { %586 = vrot.lane.b32.xlu1 %v585_v2, %s977_s5 }
 0x289   :  { %v940_v3 = vpop.permute.xlu0 %939 }
 0x28a   :  { %v942_v7 = vunpack.i.h.bf16 %v940_v3  ;;  %v941_v8 = vunpack.i.l.bf16 %v940_v3 }
 0x28b   :  { %v945_v4 = vpop.permute.xlu1 %944 }
 0x28c   :  { %v947_v5 = vunpack.i.h.bf16 %v945_v4  ;;  %v946_v6 = vunpack.i.l.bf16 %v945_v4 }
 0x28d   :  { %v570_v23 = vpop.permute.xlu0 %569 }
 0x28e   :  { %v572_v51 = vsel %vm239_vm6, %v555_v53, %v947_v5  ;;  %v589_v9 = vsel %vm239_vm6, %v557_v25, %v946_v6 }
 0x28f   :  { %v573_v10 = vsel %vm247_vm7, %v572_v51, %v942_v7  ;;  %v587_v11 = vpop.permute.xlu1 %586  ;;  %v590_v52 = vsel %vm247_vm7, %v589_v9, %v941_v8 }
 0x290   :  { %v591_v20 = vsel %vm574_vm10, %v590_v52, %v587_v11  ;;  %v575_v14 = vsel %vm574_vm10, %v573_v10, %v570_v23 }
 0x291   :  { %v593_v12 = vrot.slane %v591_v20, 7 }
 0x293   :  { %v596_v15 = vsel %vm595_vm11, %v575_v14, %v593_v12 }
 0x294   :  { %914 = vmatmul.mubr.f32.vlgmr.msra.gmra.mxu1 %v596_v15 }
 0x354   :  { %v686_v19 = vpop.f32.mrf.mxu1 }
 0x355   :  { %v687_v21 = vadd.f32 %v816_v18, %v686_v19 }
 0x356   :  { %v915_v22 = vpop.f32.mrf.mxu1 }
 0x357   :  { %v690_v24 = vmax.f32 %v687_v21, 0.0 }
 0x359   :  { %925 = vmatmul.mubr.msk.f32.vlgmr.msra.gmra.mxu0 %vm239_vm6, %v690_v24 }
 0x419   :  { %v771_v28 = vpop.f32.mrf.mxu0 }
 0x41a   :  { %v772_v13 = vadd.f32 %v817_v27, %v771_v28 }
 0x41b   :  { %v926_v29 = vpop.f32.mrf.mxu0 }
 0x41c   :  { %776 = vst.msk [vmem:[#allocation2] sm:$0x3] %vm775_vm12, %v772_v13 }
 0x41d   :  { %959 = shalt.err (!%p956_p4)
}
 0x41e   :  { %786 = dma.vmem_to_hbm [thread:$0]  %s784_s7, 32, %s1381_s9, [#allocation3]  }
 0x41f   :  { %968 = dma.done.wait [#allocation3], 32  }
 0x420   :  { %969 = vsyncadd [#allocation3], 4294967264 }
 0x421   :  { %790 = vsyncpa [#allocation3], 1 }

</bundles_post_ra>
